<compile_context>
chip_gen: v6e
topology: v6e:2x2x1
jax: 0.10.0
libtpu: 0.0.40
codegen_flags: <defaults>
</compile_context>

<pallas_src>
import jax
import jax.numpy as jnp
from jax.experimental import pallas as pl
from jax.experimental.pallas import tpu as pltpu

H1, H2 = 400, 300            # logical hidden dims (as in the PyTorch module)
H1_PAD, H2_PAD = 512, 384    # lane-padded hidden dims (multiples of 128)
OUT_PAD = 128                # lane-padded output dim


def actor_mlp_kernel(x_ref, w1_ref, b1_ref, w2_ref, b2_ref, w3_ref, b3_ref, o_ref):
    # x_ref:  (tm, input_dim)  f32
    # w1_ref: (input_dim, H1_PAD) bf16   b1_ref: (1, H1_PAD)  f32
    # w2_ref: (H1_PAD, H2_PAD)   bf16    b2_ref: (1, H2_PAD)  f32
    # w3_ref: (H2_PAD, OUT_PAD)  bf16    b3_ref: (1, OUT_PAD) f32
    # o_ref:  (tm, OUT_PAD) f32
    x = x_ref[...].astype(jnp.bfloat16)

    h1 = jnp.dot(x, w1_ref[...], preferred_element_type=jnp.float32) + b1_ref[...]
    h1 = jnp.maximum(h1, 0.0).astype(jnp.bfloat16)      # ReLU (padded cols stay 0)

    h2 = jnp.dot(h1, w2_ref[...], preferred_element_type=jnp.float32) + b2_ref[...]
    h2 = jnp.maximum(h2, 0.0).astype(jnp.bfloat16)      # ReLU (padded cols stay 0)

    out = jnp.dot(h2, w3_ref[...], preferred_element_type=jnp.float32) + b3_ref[...]
    o_ref[...] = out.astype(o_ref.dtype)


def actor_forward(state, params, output_dim, *, tm=1024):
    """state: (batch, input_dim) f32 -> (batch, output_dim) f32."""
    w1, b1, w2, b2, w3, b3 = params
    batch, in_dim = state.shape

    if batch <= tm:
        # Small-batch fast path: one block, no grid, no wrapper padding.
        vmem = pl.BlockSpec(memory_space=pltpu.MemorySpace.VMEM)
        out = pl.pallas_call(
            actor_mlp_kernel,
            out_shape=jax.ShapeDtypeStruct((batch, OUT_PAD), jnp.float32),
            in_specs=[vmem] * 7,
            out_specs=vmem,
        )(state, w1, b1, w2, b2, w3, b3)
        return out[:, :output_dim]

    # Large-batch path: 1-D "parallel" grid over rows. Weights/biases are
    # VMEM-resident (constant index_map) and single-buffered; only the
    # activation input/output tiles are double-buffered by the pipeline.
    def resident(arr):
        return pl.BlockSpec(arr.shape, lambda i: (0, 0),
                            pipeline_mode=pl.Buffered(1))

    out = pl.pallas_call(
        actor_mlp_kernel,
        out_shape=jax.ShapeDtypeStruct((batch, OUT_PAD), jnp.float32),
        grid=(pl.cdiv(batch, tm),),
        in_specs=[
            pl.BlockSpec((tm, in_dim), lambda i: (i, 0)),
            resident(w1), resident(b1),
            resident(w2), resident(b2),
            resident(w3), resident(b3),
        ],
        out_specs=pl.BlockSpec((tm, OUT_PAD), lambda i: (i, 0)),
        compiler_params=pltpu.CompilerParams(dimension_semantics=("parallel",)),
    )(state, w1, b1, w2, b2, w3, b3)
    return out[:, :output_dim]


def init_actor_params(key, input_dim, output_dim, init_w=0.003):
    """Mirror nn.Linear default init (+ custom last layer). Returns
    (padded_bf16_params_for_kernel, logical_f32_params_for_reference)."""
    k1, k2, k3, k4, k5, k6 = jax.random.split(key, 6)

    def linear_init(kw, kb, fan_in, fan_out):
        bound = 1.0 / (fan_in ** 0.5)
        w = jax.random.uniform(kw, (fan_in, fan_out), jnp.float32, -bound, bound)
        b = jax.random.uniform(kb, (1, fan_out), jnp.float32, -bound, bound)
        return w, b

    w1, b1 = linear_init(k1, k2, input_dim, H1)
    w2, b2 = linear_init(k3, k4, H1, H2)
    # Final layer: uniform(-init_w, init_w), as in the PyTorch module.
    w3 = jax.random.uniform(k5, (H2, output_dim), jnp.float32, -init_w, init_w)
    b3 = jax.random.uniform(k6, (1, output_dim), jnp.float32, -init_w, init_w)

    # Zero-pad hidden/output dims to 128-lane multiples once, offline.
    # Weights stored bf16 (MXU-native); biases stay f32.
    w1p = jnp.zeros((input_dim, H1_PAD), jnp.float32).at[:, :H1].set(w1)
    b1p = jnp.zeros((1, H1_PAD), jnp.float32).at[:, :H1].set(b1)
    w2p = jnp.zeros((H1_PAD, H2_PAD), jnp.float32).at[:H1, :H2].set(w2)
    b2p = jnp.zeros((1, H2_PAD), jnp.float32).at[:, :H2].set(b2)
    w3p = jnp.zeros((H2_PAD, OUT_PAD), jnp.float32).at[:H2, :output_dim].set(w3)
    b3p = jnp.zeros((1, OUT_PAD), jnp.float32).at[:, :output_dim].set(b3)

    padded = (w1p.astype(jnp.bfloat16), b1p,
              w2p.astype(jnp.bfloat16), b2p,
              w3p.astype(jnp.bfloat16), b3p)
    logical = (w1, b1, w2, b2, w3, b3)
    return padded, logical


def reference_forward(state, params):
    w1, b1, w2, b2, w3, b3 = params
    h1 = jnp.maximum(state @ w1 + b1, 0.0)
    h2 = jnp.maximum(h1 @ w2 + b2, 0.0)
    return h2 @ w3 + b3


if __name__ == "__main__":
    key = jax.random.PRNGKey(0)
    k_params, k_state, k_big = jax.random.split(key, 3)

    batch, input_dim, output_dim = 2, 32, 8
    params, params_ref = init_actor_params(k_params, input_dim, output_dim)

    # Small-batch path (single block, no grid, no wrapper padding).
    state = jax.random.normal(k_state, (batch, input_dim), jnp.float32)
    out = jax.block_until_ready(actor_forward(state, params, output_dim))
    ref = reference_forward(state, params_ref)
    assert out.shape == (batch, output_dim)
    # bf16 MXU operands (f32 accumulation) -> loosened tolerances vs f32 ref.
    assert jnp.allclose(out, ref, atol=2e-2, rtol=2e-2), "small-batch mismatch"

    # Large-batch path (parallel 1-D grid over rows, resident bf16 weights).
    big_batch = 2048
    state_big = jax.random.normal(k_big, (big_batch, input_dim), jnp.float32)
    out_big = jax.block_until_ready(
        actor_forward(state_big, params, output_dim, tm=1024))
    ref_big = reference_forward(state_big, params_ref)
    assert out_big.shape == (big_batch, output_dim)
    assert jnp.allclose(out_big, ref_big, atol=2e-2, rtol=2e-2), "big-batch mismatch"

    print("KERNEL_OK")
</pallas_src>

<mosaic_0001>
module attributes {stable_mosaic.version = 11 : i64} {
  func.func @actor_mlp_kernel(%arg0: memref<2x32xf32, #tpu.memory_space<vmem>>, %arg1: memref<32x512xbf16, #tpu.memory_space<vmem>>, %arg2: memref<1x512xf32, #tpu.memory_space<vmem>>, %arg3: memref<512x384xbf16, #tpu.memory_space<vmem>>, %arg4: memref<1x384xf32, #tpu.memory_space<vmem>>, %arg5: memref<384x128xbf16, #tpu.memory_space<vmem>>, %arg6: memref<1x128xf32, #tpu.memory_space<vmem>>, %arg7: memref<2x128xf32, #tpu.memory_space<vmem>>) attributes {dimension_semantics = [], scalar_prefetch = 0 : i64, scratch_operands = 0 : i64, tpu.core_type = #tpu.core_type<tc>} {
    %c0 = arith.constant 0 : index
    %c0_0 = arith.constant 0 : index
    %0 = vector.load %arg0[%c0, %c0_0] : memref<2x32xf32, #tpu.memory_space<vmem>>, vector<2x32xf32>
    %1 = arith.truncf %0 : vector<2x32xf32> to vector<2x32xbf16>
    %c0_1 = arith.constant 0 : index
    %c0_2 = arith.constant 0 : index
    %2 = vector.load %arg1[%c0_1, %c0_2] : memref<32x512xbf16, #tpu.memory_space<vmem>>, vector<32x512xbf16>
    %cst = arith.constant dense<0.000000e+00> : vector<2x512xf32>
    %3 = tpu.matmul %1, %2, %cst {dimension_numbers = #tpu.dot_dimension_numbers<[1], [0], [0], [1], [0, 0, 1, 1], [], []>} : vector<2x32xbf16>, vector<32x512xbf16>, vector<2x512xf32> -> vector<2x512xf32>
    %c0_3 = arith.constant 0 : index
    %c0_4 = arith.constant 0 : index
    %4 = vector.load %arg2[%c0_3, %c0_4] : memref<1x512xf32, #tpu.memory_space<vmem>>, vector<1x512xf32>
    %5 = vector.broadcast %4 : vector<1x512xf32> to vector<2x512xf32>
    %6 = arith.addf %3, %5 : vector<2x512xf32>
    %cst_5 = arith.constant 0.000000e+00 : f32
    %7 = vector.broadcast %cst_5 : f32 to vector<2x512xf32>
    %8 = arith.maximumf %6, %7 : vector<2x512xf32>
    %9 = arith.truncf %8 : vector<2x512xf32> to vector<2x512xbf16>
    %c0_6 = arith.constant 0 : index
    %c0_7 = arith.constant 0 : index
    %10 = vector.load %arg3[%c0_6, %c0_7] : memref<512x384xbf16, #tpu.memory_space<vmem>>, vector<512x384xbf16>
    %cst_8 = arith.constant dense<0.000000e+00> : vector<2x384xf32>
    %11 = tpu.matmul %9, %10, %cst_8 {dimension_numbers = #tpu.dot_dimension_numbers<[1], [0], [0], [1], [0, 0, 1, 1], [], []>} : vector<2x512xbf16>, vector<512x384xbf16>, vector<2x384xf32> -> vector<2x384xf32>
    %c0_9 = arith.constant 0 : index
    %c0_10 = arith.constant 0 : index
    %12 = vector.load %arg4[%c0_9, %c0_10] : memref<1x384xf32, #tpu.memory_space<vmem>>, vector<1x384xf32>
    %13 = vector.broadcast %12 : vector<1x384xf32> to vector<2x384xf32>
    %14 = arith.addf %11, %13 : vector<2x384xf32>
    %cst_11 = arith.constant 0.000000e+00 : f32
    %15 = vector.broadcast %cst_11 : f32 to vector<2x384xf32>
    %16 = arith.maximumf %14, %15 : vector<2x384xf32>
    %17 = arith.truncf %16 : vector<2x384xf32> to vector<2x384xbf16>
    %c0_12 = arith.constant 0 : index
    %c0_13 = arith.constant 0 : index
    %18 = vector.load %arg5[%c0_12, %c0_13] : memref<384x128xbf16, #tpu.memory_space<vmem>>, vector<384x128xbf16>
    %cst_14 = arith.constant dense<0.000000e+00> : vector<2x128xf32>
    %19 = tpu.matmul %17, %18, %cst_14 {dimension_numbers = #tpu.dot_dimension_numbers<[1], [0], [0], [1], [0, 0, 1, 1], [], []>} : vector<2x384xbf16>, vector<384x128xbf16>, vector<2x128xf32> -> vector<2x128xf32>
    %c0_15 = arith.constant 0 : index
    %c0_16 = arith.constant 0 : index
    %20 = vector.load %arg6[%c0_15, %c0_16] : memref<1x128xf32, #tpu.memory_space<vmem>>, vector<1x128xf32>
    %21 = vector.broadcast %20 : vector<1x128xf32> to vector<2x128xf32>
    %22 = arith.addf %19, %21 : vector<2x128xf32>
    %c0_17 = arith.constant 0 : index
    %c0_18 = arith.constant 0 : index
    %23 = vector.load %arg7[%c0_17, %c0_18] : memref<2x128xf32, #tpu.memory_space<vmem>>, vector<2x128xf32>
    tpu.vector_store %arg7[%c0_17, %c0_18], %22 {strides = array<i32>} : memref<2x128xf32, #tpu.memory_space<vmem>>, vector<2x128xf32>,
    return
  }
}

</mosaic_0001>

<bundles_post_ra>
// kernel: tpu_custom_call.1
= control target key start
LH: loop header
LB: loop body
LE: loop exit
PB: predicated region body
PF: predicated region fallthrough
CT: control target
= control target key end

     0   :  { %12 = vsyncpa [#allocation3], 0  ;;  %s2018_s0 = inlined_call_operand.hbm [shape: f32[2,32], index: 0, kind: input, shape index: {}]   ;;  %s2019_s1 = inlined_call_operand.hbm [shape: bf16[32,512], index: 1, kind: input, shape index: {}]   ;;  %s2020_s2 = inlined_call_operand.hbm [shape: f32[1,512], index: 2, kind: input, shape index: {}]   ;;  %s2021_s3 = inlined_call_operand.hbm [shape: bf16[512,384], index: 3, kind: input, shape index: {}]   ;;  %s2022_s4 = inlined_call_operand.vmem [shape: f32[1,384], index: 4, kind: input, shape index: {}]   ;;  %s2023_s5 = inlined_call_operand.hbm [shape: bf16[384,128], index: 5, kind: input, shape index: {}]   ;;  %s2024_s6 = inlined_call_operand.vmem [shape: f32[1,128], index: 6, kind: input, shape index: {}]   ;;  %s2025_s7 = inlined_call_operand.hbm [shape: f32[2,128], index: 7, kind: output, shape index: {}]  }
   0x1   :  { %13 = vsyncpa [#allocation6], 0 }
   0x2   :  { %14 = vsyncpa [#allocation9], 0 }
   0x3   :  { %15 = vsyncpa [#allocation4], 0  ;;  %s1913_s24 = smov [#allocation5]  }
   0x4   :  { %s31_s25 = sshll.u32 %s1913_s24, 4  ;;  %s32_s25 = int_to_ptr.vmem [resolvable:$true] %s31_s25 }
   0x5   :  { %s1793_s26 = scalar_lea.vmem %s32_s25, 1024  ;;  %p1798_p1 = scmp.lt.s32.totalorder %s32_s25, %s32_s25 }
   0x6   :  { %p1794_p0 = scmp.ne.s32.totalorder %s32_s25, %s1793_s26  ;;  %p1799_p2 = scmp.lt.s32.totalorder %s1793_s26, %s1793_s26 }
   0x8   :  { %p1800_p3 = por %p1799_p2, %p1798_p1 }
   0xa   :  { %p1801_p4 = pnand %p1800_p3, %p1794_p0 }
   0xc   :  { %1804 = shalt.err (!%p1801_p4)
}
   0xd   :  { %s1914_s27 = smov 256   ;;  %s1915_s28 = smov 16  }
   0xe   :  { %37 = dma.hbm_to_vmem [thread:$0]  %s2019_s1, 1024, %s32_s25, [#allocation6], %s1914_s27, %s1914_s27, %s1915_s28  }
   0xf   :  { %s1916_s8 = smov [#allocation8]  }
  0x10   :  { %s53_s9 = sshll.u32 %s1916_s8, 4  ;;  %s54_s9 = int_to_ptr.vmem [resolvable:$true] %s53_s9 }
  0x11   :  { %s1813_s10 = scalar_lea.vmem %s54_s9, 12288  ;;  %p1818_p6 = scmp.lt.s32.totalorder %s54_s9, %s54_s9 }
  0x12   :  { %p1814_p5 = scmp.ne.s32.totalorder %s54_s9, %s1813_s10  ;;  %p1819_p7 = scmp.lt.s32.totalorder %s1813_s10, %s1813_s10 }
  0x14   :  { %p1820_p8 = por %p1819_p7, %p1818_p6 }
  0x16   :  { %p1821_p9 = pnand %p1820_p8, %p1814_p5 }
  0x18   :  { %1824 = shalt.err (!%p1821_p9)
}
  0x19   :  { %s1917_s11 = smov 192   ;;  %s1918_s12 = smov 12  }
  0x1a   :  { %59 = dma.hbm_to_vmem [thread:$0]  %s2021_s3, 12288, %s54_s9, [#allocation9], %s1917_s11, %s1917_s11, %s1918_s12  }
  0x1b   :  { %s1919_s15 = smov [#allocation2]   ;;  %s1920_s17 = smov [#allocation7]  }
  0x1c   :  { %s22_s16 = sshll.u32 %s1919_s15, 4  ;;  %s44_s1 = sshll.u32 %s1920_s17, 4  ;;  %s23_s16 = int_to_ptr.vmem [resolvable:$true] %s22_s16  ;;  %s45_s1 = int_to_ptr.vmem [resolvable:$true] %s44_s1 }
  0x1d   :  { %s1833_s18 = scalar_lea.vmem %s23_s16, 32  ;;  %p1838_p11 = scmp.lt.s32.totalorder %s23_s16, %s23_s16 }
  0x1e   :  { %p1834_p10 = scmp.ne.s32.totalorder %s23_s16, %s1833_s18  ;;  %p1839_p12 = scmp.lt.s32.totalorder %s1833_s18, %s1833_s18 }
  0x20   :  { %p1840_p13 = por %p1839_p12, %p1838_p11 }
  0x22   :  { %p1841_p0 = pnand %p1840_p13, %p1834_p10 }
  0x24   :  { %1844 = shalt.err (!%p1841_p0)
}
  0x25   :  { %25 = dma.hbm_to_vmem [thread:$0]  %s2018_s0, 32, %s23_s16, [#allocation3]  }
  0x26   :  { %s1853_s21 = scalar_lea.vmem %s45_s1, 64  ;;  %p1858_p2 = scmp.lt.s32.totalorder %s45_s1, %s45_s1 }
  0x27   :  { %p1854_p1 = scmp.ne.s32.totalorder %s45_s1, %s1853_s21  ;;  %p1859_p3 = scmp.lt.s32.totalorder %s1853_s21, %s1853_s21 }
  0x29   :  { %p1860_p4 = por %p1859_p3, %p1858_p2 }
  0x2b   :  { %p1861_p5 = pnand %p1860_p4, %p1854_p1 }
  0x2d   :  { %1864 = shalt.err (!%p1861_p5)
}
  0x2e   :  { %47 = dma.hbm_to_vmem [thread:$0]  %s2020_s2, 64, %s45_s1, [#allocation6]  }
  0x2f   :  { %s1921_s23 = smov [#allocation10]  }
  0x30   :  { %s67_s24 = sshll.u32 %s1921_s23, 4  ;;  %s68_s24 = int_to_ptr.vmem [resolvable:$true] %s67_s24 }
  0x31   :  { %s1873_s25 = scalar_lea.vmem %s68_s24, 3072  ;;  %p1878_p7 = scmp.lt.s32.totalorder %s68_s24, %s68_s24 }
  0x32   :  { %p1874_p6 = scmp.ne.s32.totalorder %s68_s24, %s1873_s25  ;;  %p1879_p8 = scmp.lt.s32.totalorder %s1873_s25, %s1873_s25 }
  0x34   :  { %p1880_p9 = por %p1879_p8, %p1878_p7 }
  0x36   :  { %p1881_p10 = pnand %p1880_p9, %p1874_p6 }
  0x38   :  { %1884 = shalt.err (!%p1881_p10)
}
  0x39   :  { %s1922_s0 = smov 64   ;;  %s1923_s26 = smov 4  }
  0x3a   :  { %73 = dma.hbm_to_vmem [thread:$0]  %s2023_s5, 3072, %s68_s24, [#allocation9], %s1922_s0, %s1922_s0, %s1923_s26  }
  0x3b   :  { %1905 = dma.done.wait [#allocation3], 32  }
  0x3c   :  { %1906 = vsyncadd [#allocation3], 4294967264 }
  0x3d   :  { %1907 = dma.done.wait [#allocation6], 1088  }
  0x3e   :  { %1908 = vsyncadd [#allocation6], 4294966208 }
  0x3f   :  { %1909 = dma.done.wait [#allocation9], 15360  }
  0x40   :  { %1910 = vsyncadd [#allocation9], 4294951936  ;;  %v1924_v0 = vmov 0   ;;  %v1621_v1 = vld [vmem:[#allocation5 + $0x24] ss:$16 sps:$4 sm:$0xff]   ;;  %vm164_vm0 = vcmask 261120  }
  0x41   :  { %200 = vmatprep.mubr.bf16.mxu0 %v1924_v0  ;;  %241 = vmatprep.mubr.bf16.mxu1 %v1924_v0  ;;  %v1623_v2 = vld [vmem:[#allocation5 + $0x2c] ss:$16 sps:$4 sm:$0xff]   ;;  %v1625_v3 = vld [vmem:[#allocation5 + $0x20] ss:$16 sps:$4 sm:$0xff]   ;;  %v1626_v4 = vld [vmem:[#allocation5 + $0x28] ss:$16 sps:$4 sm:$0xff]  }
  0x42   :  { %180 = vmatprep.subr.bf16.mxu0 %v1621_v1  ;;  %221 = vmatprep.subr.bf16.mxu1 %v1623_v2  ;;  %v1627_v5 = vld [vmem:[#allocation5 + $0x4] ss:$16 sps:$4 sm:$0xff]   ;;  %v1629_v6 = vld [vmem:[#allocation5 + $0xc] ss:$16 sps:$4 sm:$0xff]   ;;  %v1631_v7 = vld [vmem:[#allocation5] ss:$16 sps:$4 sm:$0xff]  }
  0x43   :  { %181 = vmatpush1.bf16.msra.mxu0 %v1625_v3  ;;  %222 = vmatpush1.bf16.msra.mxu1 %v1626_v4  ;;  %v1632_v8 = vld [vmem:[#allocation5 + $0x8] ss:$16 sps:$4 sm:$0xff]   ;;  %v92_v9 = vld [vmem:[#allocation2] sm:$0x3]  ;;  %v1639_v17 = vld [vmem:[#allocation8 + $0x90] ss:$12 sps:$4 sm:$0xff]  }
  0x44   :  { %182 = vmatprep.subr.bf16.mxu0 %v1627_v5  ;;  %223 = vmatprep.subr.bf16.mxu1 %v1629_v6  ;;  %v1633_v10 = vld [vmem:[#allocation8 + $0xa8] ss:$12 sps:$4 sm:$0xff]   ;;  %v1635_v11 = vld [vmem:[#allocation8 + $0xac] ss:$12 sps:$4 sm:$0xff]   ;;  %v93_v12 = vpack.c.bf16 %v92_v9, %v92_v9  ;;  %v1642_v18 = vld [vmem:[#allocation8 + $0x210] ss:$12 sps:$4 sm:$0xff]  }
  0x45   :  { %v1636_v13 = vld [vmem:[#allocation8 + $0x228] ss:$12 sps:$4 sm:$0xff]   ;;  %v1638_v14 = vld [vmem:[#allocation8 + $0x22c] ss:$12 sps:$4 sm:$0xff]   ;;  %v1653_v23 = vld [vmem:[#allocation8 + $0x64] ss:$12 sps:$4 sm:$0xff]  }
  0x46   :  { %v1641_v15 = vld [vmem:[#allocation8 + $0x94] ss:$12 sps:$4 sm:$0xff]   ;;  %v1647_v19 = vld [vmem:[#allocation8 + $0x7c] ss:$12 sps:$4 sm:$0xff]   ;;  %v1645_v21 = vld [vmem:[#allocation8 + $0x78] ss:$12 sps:$4 sm:$0xff]  }
  0x47   :  { %183 = vmatpush1.bf16.msra.mxu0 %v1631_v7  ;;  %224 = vmatpush1.bf16.msra.mxu1 %v1632_v8  ;;  %v1644_v16 = vld [vmem:[#allocation8 + $0x214] ss:$12 sps:$4 sm:$0xff]   ;;  %v1650_v20 = vld [vmem:[#allocation8 + $0x1fc] ss:$12 sps:$4 sm:$0xff]   ;;  %v1648_v22 = vld [vmem:[#allocation8 + $0x1f8] ss:$12 sps:$4 sm:$0xff]  }
  0x48   :  { %915 = vmatprep.subr.bf16.mxu0 %v1635_v11  ;;  %956 = vmatprep.subr.bf16.mxu1 %v1638_v14  ;;  %v1656_v24 = vld [vmem:[#allocation8 + $0x1e4] ss:$12 sps:$4 sm:$0xff]   ;;  %v1651_v25 = vld [vmem:[#allocation8 + $0x60] ss:$12 sps:$4 sm:$0xff]   ;;  %v1657_v29 = vld [vmem:[#allocation8 + $0x48] ss:$12 sps:$4 sm:$0xff]  }
  0x49   :  { %v1654_v26 = vld [vmem:[#allocation8 + $0x1e0] ss:$12 sps:$4 sm:$0xff]   ;;  %v1660_v30 = vld [vmem:[#allocation8 + $0x1c8] ss:$12 sps:$4 sm:$0xff]   ;;  %v1663_v33 = vld [vmem:[#allocation8 + $0x30] ss:$12 sps:$4 sm:$0xff]  }
  0x4a   :  { %1388 = vmatmul.mubr.msk.bf16.vlgmr.msra.gmra.mxu0 %vm164_vm0, %v93_v12  ;;  %1389 = vmatmul.mubr.msk.bf16.vlgmr.msra.gmra.mxu1 %vm164_vm0, %v93_v12  ;;  %v1659_v27 = vld [vmem:[#allocation8 + $0x4c] ss:$12 sps:$4 sm:$0xff]   ;;  %v1665_v31 = vld [vmem:[#allocation8 + $0x34] ss:$12 sps:$4 sm:$0xff]   ;;  %v1666_v34 = vld [vmem:[#allocation8 + $0x1b0] ss:$12 sps:$4 sm:$0xff]  }
  0x4b   :  { %916 = vmatpush1.bf16.msra.mxu0 %v1633_v10  ;;  %957 = vmatpush1.bf16.msra.mxu1 %v1636_v13  ;;  %v1662_v28 = vld [vmem:[#allocation8 + $0x1cc] ss:$12 sps:$4 sm:$0xff]   ;;  %v1668_v32 = vld [vmem:[#allocation8 + $0x1b4] ss:$12 sps:$4 sm:$0xff]   ;;  %v1671_v35 = vld [vmem:[#allocation8 + $0x1c] ss:$12 sps:$4 sm:$0xff]   ;;  %v104_v13 = vlaneseq }
  0x4c   :  { %917 = vmatprep.subr.bf16.mxu0 %v1641_v15  ;;  %958 = vmatprep.subr.bf16.mxu1 %v1644_v16  ;;  %v1674_v36 = vld [vmem:[#allocation8 + $0x19c] ss:$12 sps:$4 sm:$0xff]   ;;  %v1669_v37 = vld [vmem:[#allocation8 + $0x18] ss:$12 sps:$4 sm:$0xff]   ;;  %v1675_v41 = vld [vmem:[#allocation8] ss:$12 sps:$4 sm:$0xff]  }
  0x4d   :  { %v1672_v38 = vld [vmem:[#allocation8 + $0x198] ss:$12 sps:$4 sm:$0xff]   ;;  %v1678_v42 = vld [vmem:[#allocation8 + $0x180] ss:$12 sps:$4 sm:$0xff]   ;;  %v1681_v45 = vld [vmem:[#allocation8 + $0x168] ss:$12 sps:$4 sm:$0xff]  }
  0x4e   :  { %v1677_v39 = vld [vmem:[#allocation8 + $0x4] ss:$12 sps:$4 sm:$0xff]   ;;  %v1683_v43 = vld [vmem:[#allocation8 + $0x16c] ss:$12 sps:$4 sm:$0xff]   ;;  %v1684_v46 = vld [vmem:[#allocation8 + $0x2e8] ss:$12 sps:$4 sm:$0xff]  }
  0x4f   :  { %918 = vmatpush1.bf16.msra.mxu0 %v1639_v17  ;;  %959 = vmatpush1.bf16.msra.mxu1 %v1642_v18  ;;  %v1680_v40 = vld [vmem:[#allocation8 + $0x184] ss:$12 sps:$4 sm:$0xff]   ;;  %v1686_v44 = vld [vmem:[#allocation8 + $0x2ec] ss:$12 sps:$4 sm:$0xff]   ;;  %v1689_v47 = vld [vmem:[#allocation8 + $0x154] ss:$12 sps:$4 sm:$0xff]  }
  0x50   :  { %919 = vmatprep.subr.bf16.mxu0 %v1647_v19  ;;  %960 = vmatprep.subr.bf16.mxu1 %v1650_v20  ;;  %v1692_v48 = vld [vmem:[#allocation8 + $0x2d4] ss:$12 sps:$4 sm:$0xff]   ;;  %v1687_v49 = vld [vmem:[#allocation8 + $0x150] ss:$12 sps:$4 sm:$0xff]   ;;  %v1693_v53 = vld [vmem:[#allocation8 + $0x138] ss:$12 sps:$4 sm:$0xff]  }
  0x51   :  { %v1690_v50 = vld [vmem:[#allocation8 + $0x2d0] ss:$12 sps:$4 sm:$0xff]   ;;  %v1696_v54 = vld [vmem:[#allocation8 + $0x2b8] ss:$12 sps:$4 sm:$0xff]   ;;  %v1699_v57 = vld [vmem:[#allocation8 + $0x120] ss:$12 sps:$4 sm:$0xff]  }
  0x52   :  { %v1695_v51 = vld [vmem:[#allocation8 + $0x13c] ss:$12 sps:$4 sm:$0xff]   ;;  %v1701_v55 = vld [vmem:[#allocation8 + $0x124] ss:$12 sps:$4 sm:$0xff]   ;;  %v1702_v58 = vld [vmem:[#allocation8 + $0x2a0] ss:$12 sps:$4 sm:$0xff]  }
  0x53   :  { %920 = vmatpush1.bf16.msra.mxu0 %v1645_v21  ;;  %961 = vmatpush1.bf16.msra.mxu1 %v1648_v22  ;;  %v1698_v52 = vld [vmem:[#allocation8 + $0x2bc] ss:$12 sps:$4 sm:$0xff]   ;;  %v1704_v56 = vld [vmem:[#allocation8 + $0x2a4] ss:$12 sps:$4 sm:$0xff]   ;;  %v1707_v59 = vld [vmem:[#allocation8 + $0x10c] ss:$12 sps:$4 sm:$0xff]  }
  0x54   :  { %921 = vmatprep.subr.bf16.mxu0 %v1653_v23  ;;  %962 = vmatprep.subr.bf16.mxu1 %v1656_v24  ;;  %v1710_v60 = vld [vmem:[#allocation8 + $0x28c] ss:$12 sps:$4 sm:$0xff]   ;;  %v1705_v61 = vld [vmem:[#allocation8 + $0x108] ss:$12 sps:$4 sm:$0xff]   ;;  %v1711_v1 = vld [vmem:[#allocation8 + $0xf0] ss:$12 sps:$4 sm:$0xff]  }
  0x55   :  { %v1708_v62 = vld [vmem:[#allocation8 + $0x288] ss:$12 sps:$4 sm:$0xff]   ;;  %v1714_v2 = vld [vmem:[#allocation8 + $0x270] ss:$12 sps:$4 sm:$0xff]   ;;  %v1717_v5 = vld [vmem:[#allocation8 + $0xd8] ss:$12 sps:$4 sm:$0xff]  }
  0x56   :  { %v1713_v63 = vld [vmem:[#allocation8 + $0xf4] ss:$12 sps:$4 sm:$0xff]   ;;  %v1719_v3 = vld [vmem:[#allocation8 + $0xdc] ss:$12 sps:$4 sm:$0xff]   ;;  %v1720_v6 = vld [vmem:[#allocation8 + $0x258] ss:$12 sps:$4 sm:$0xff]  }
  0x57   :  { %922 = vmatpush1.bf16.msra.mxu0 %v1651_v25  ;;  %963 = vmatpush1.bf16.msra.mxu1 %v1654_v26  ;;  %v1716_v0 = vld [vmem:[#allocation8 + $0x274] ss:$12 sps:$4 sm:$0xff]   ;;  %v1722_v4 = vld [vmem:[#allocation8 + $0x25c] ss:$12 sps:$4 sm:$0xff]   ;;  %v1725_v7 = vld [vmem:[#allocation8 + $0xc4] ss:$12 sps:$4 sm:$0xff]  }
  0x58   :  { %923 = vmatprep.subr.bf16.mxu0 %v1659_v27  ;;  %964 = vmatprep.subr.bf16.mxu1 %v1662_v28  ;;  %v1728_v8 = vld [vmem:[#allocation8 + $0x244] ss:$12 sps:$4 sm:$0xff]   ;;  %v1723_v9 = vld [vmem:[#allocation8 + $0xc0] ss:$12 sps:$4 sm:$0xff]   ;;  %v1983_v14 = vshrl.u32 %v104_v13, 7  ;;  %vm1926_vm1 = vmmov 0  }
  0x59   :  { %v1726_v10 = vld [vmem:[#allocation8 + $0x240] ss:$12 sps:$4 sm:$0xff]   ;;  %v1729_v11 = vld [vmem:[#allocation8 + $0x170] ss:$12 sps:$4 sm:$0xff]   ;;  %s1927_s30 = smov [#allocation11]  }
  0x5a   :  { %v1730_v12 = vld [vmem:[#allocation8 + $0x2f0] ss:$12 sps:$4 sm:$0xff]   ;;  %v106_v15 = vsub.s32 0, %v1983_v14  ;;  %v114_v16 = vsub.s32 2, %v1983_v14  ;;  %v110_v18 = vsub.s32 1, %v1983_v14  ;;  %v118_v19 = vsub.s32 3, %v1983_v14 }
  0x5b   :  { %924 = vmatpush1.bf16.msra.mxu0 %v1657_v29  ;;  %965 = vmatpush1.bf16.msra.mxu1 %v1660_v30  ;;  %v102_v17 = vld [vmem:[#allocation7] sm:$0xf]  ;;  %v1764_v13 = vld [vmem:[#allocation10 + $0x30] sm:$0xff]   ;;  %v1486_v14 = vld [vmem:[%s2024_s6] ss:$0 sm:$0xff]  ;;  %s1369_s8 = sshll.u32 %s1927_s30, 4  ;;  %s1370_s8 = int_to_ptr.vmem [resolvable:$true] %s1369_s8 }
  0x5c   :  { %925 = vmatprep.subr.bf16.mxu0 %v1665_v31  ;;  %966 = vmatprep.subr.bf16.mxu1 %v1668_v32  ;;  %v107_v20 = vrot.slane %v102_v17, %v106_v15  ;;  %v115_v21 = vrot.slane %v102_v17, %v114_v16  ;;  %v111_v22 = vrot.slane %v102_v17, %v110_v18  ;;  %s1885_s9 = scalar_lea.vmem %s1370_s8, 32  ;;  %p1890_p12 = scmp.lt.s32.totalorder %s1370_s8, %s1370_s8 }
  0x5d   :  { %v119_v23 = vrot.slane %v102_v17, %v118_v19  ;;  %v1765_v17 = vld [vmem:[#allocation10 + $0x68] sm:$0xff]   ;;  %p1886_p11 = scmp.ne.s32.totalorder %s1370_s8, %s1885_s9  ;;  %p1891_p13 = scmp.lt.s32.totalorder %s1885_s9, %s1885_s9 }
  0x5e   :  { %v1766_v19 = vld [vmem:[#allocation10 + $0x28] sm:$0xff]  }
  0x5f   :  { %926 = vmatpush1.bf16.msra.mxu0 %v1663_v33  ;;  %967 = vmatpush1.bf16.msra.mxu1 %v1666_v34  ;;  %p1892_p0 = por %p1891_p13, %p1890_p12 }
  0x60   :  { %927 = vmatprep.subr.bf16.mxu0 %v1671_v35  ;;  %968 = vmatprep.subr.bf16.mxu1 %v1674_v36 }
  0x61   :  { %p1893_p1 = pnand %p1892_p0, %p1886_p11 }
  0x63   :  { %928 = vmatpush1.bf16.msra.mxu0 %v1669_v37  ;;  %969 = vmatpush1.bf16.msra.mxu1 %v1672_v38 }
  0x64   :  { %929 = vmatprep.subr.bf16.mxu0 %v1677_v39  ;;  %970 = vmatprep.subr.bf16.mxu1 %v1680_v40 }
  0x67   :  { %930 = vmatpush1.bf16.msra.mxu0 %v1675_v41  ;;  %971 = vmatpush1.bf16.msra.mxu1 %v1678_v42 }
  0x68   :  { %931 = vmatprep.subr.bf16.mxu0 %v1683_v43  ;;  %972 = vmatprep.subr.bf16.mxu1 %v1686_v44  ;;  %v1731_v43 = vld [vmem:[#allocation8 + $0xb0] ss:$12 sps:$4 sm:$0xff]  }
  0x69   :  { %v1732_v44 = vld [vmem:[#allocation8 + $0x230] ss:$12 sps:$4 sm:$0xff]  }
  0x6b   :  { %932 = vmatpush2.bf16.msra.mxu0 %v1681_v45  ;;  %973 = vmatpush2.bf16.msra.mxu1 %v1684_v46  ;;  %v1733_v46 = vld [vmem:[#allocation8 + $0x158] ss:$12 sps:$4 sm:$0xff]  }
  0x6c   :  { %933 = vmatprep.subr.bf16.mxu0 %v1689_v47  ;;  %974 = vmatprep.subr.bf16.mxu1 %v1692_v48  ;;  %v1734_v47 = vld [vmem:[#allocation8 + $0x2d8] ss:$12 sps:$4 sm:$0xff]  }
  0x6d   :  { %v1735_v48 = vld [vmem:[#allocation8 + $0x98] ss:$12 sps:$4 sm:$0xff]  }
  0x6f   :  { %934 = vmatpush2.bf16.msra.mxu0 %v1687_v49  ;;  %975 = vmatpush2.bf16.msra.mxu1 %v1690_v50  ;;  %v1736_v49 = vld [vmem:[#allocation8 + $0x218] ss:$12 sps:$4 sm:$0xff]   ;;  %v1737_v50 = vld [vmem:[#allocation8 + $0x140] ss:$12 sps:$4 sm:$0xff]  }
  0x70   :  { %935 = vmatprep.subr.bf16.mxu0 %v1695_v51  ;;  %976 = vmatprep.subr.bf16.mxu1 %v1698_v52  ;;  %v1738_v51 = vld [vmem:[#allocation8 + $0x2c0] ss:$12 sps:$4 sm:$0xff]  }
  0x71   :  { %v1739_v52 = vld [vmem:[#allocation8 + $0x80] ss:$12 sps:$4 sm:$0xff]  }
  0x73   :  { %936 = vmatpush2.bf16.msra.mxu0 %v1693_v53  ;;  %977 = vmatpush2.bf16.msra.mxu1 %v1696_v54  ;;  %v1740_v53 = vld [vmem:[#allocation8 + $0x200] ss:$12 sps:$4 sm:$0xff]   ;;  %v1741_v54 = vld [vmem:[#allocation8 + $0x128] ss:$12 sps:$4 sm:$0xff]  }
  0x74   :  { %937 = vmatprep.subr.bf16.mxu0 %v1701_v55  ;;  %978 = vmatprep.subr.bf16.mxu1 %v1704_v56  ;;  %v1742_v55 = vld [vmem:[#allocation8 + $0x2a8] ss:$12 sps:$4 sm:$0xff]  }
  0x75   :  { %v1743_v56 = vld [vmem:[#allocation8 + $0x68] ss:$12 sps:$4 sm:$0xff]  }
  0x77   :  { %938 = vmatpush2.bf16.msra.mxu0 %v1699_v57  ;;  %979 = vmatpush2.bf16.msra.mxu1 %v1702_v58  ;;  %v1744_v57 = vld [vmem:[#allocation8 + $0x1e8] ss:$12 sps:$4 sm:$0xff]   ;;  %v1745_v58 = vld [vmem:[#allocation8 + $0x110] ss:$12 sps:$4 sm:$0xff]  }
  0x78   :  { %939 = vmatprep.subr.bf16.mxu0 %v1707_v59  ;;  %980 = vmatprep.subr.bf16.mxu1 %v1710_v60  ;;  %v1746_v59 = vld [vmem:[#allocation8 + $0x290] ss:$12 sps:$4 sm:$0xff]  }
  0x79   :  { %v1747_v60 = vld [vmem:[#allocation8 + $0x50] ss:$12 sps:$4 sm:$0xff]  }
  0x7b   :  { %940 = vmatpush2.bf16.msra.mxu0 %v1705_v61  ;;  %981 = vmatpush2.bf16.msra.mxu1 %v1708_v62  ;;  %v1748_v61 = vld [vmem:[#allocation8 + $0x1d0] ss:$12 sps:$4 sm:$0xff]   ;;  %v1749_v62 = vld [vmem:[#allocation8 + $0xf8] ss:$12 sps:$4 sm:$0xff]  }
  0x7c   :  { %941 = vmatprep.subr.bf16.mxu0 %v1713_v63  ;;  %982 = vmatprep.subr.bf16.mxu1 %v1716_v0  ;;  %v1750_v63 = vld [vmem:[#allocation8 + $0x278] ss:$12 sps:$4 sm:$0xff]  }
  0x7d   :  { %v1751_v0 = vld [vmem:[#allocation8 + $0x38] ss:$12 sps:$4 sm:$0xff]  }
  0x7f   :  { %942 = vmatpush2.bf16.msra.mxu0 %v1711_v1  ;;  %983 = vmatpush2.bf16.msra.mxu1 %v1714_v2  ;;  %v1752_v1 = vld [vmem:[#allocation8 + $0x1b8] ss:$12 sps:$4 sm:$0xff]   ;;  %v1753_v2 = vld [vmem:[#allocation8 + $0xe0] ss:$12 sps:$4 sm:$0xff]  }
  0x80   :  { %943 = vmatprep.subr.bf16.mxu0 %v1719_v3  ;;  %984 = vmatprep.subr.bf16.mxu1 %v1722_v4  ;;  %v1754_v3 = vld [vmem:[#allocation8 + $0x260] ss:$12 sps:$4 sm:$0xff]  }
  0x81   :  { %v1755_v4 = vld [vmem:[#allocation8 + $0x20] ss:$12 sps:$4 sm:$0xff]  }
  0x83   :  { %944 = vmatpush2.bf16.msra.mxu0 %v1717_v5  ;;  %985 = vmatpush2.bf16.msra.mxu1 %v1720_v6  ;;  %v1756_v5 = vld [vmem:[#allocation8 + $0x1a0] ss:$12 sps:$4 sm:$0xff]   ;;  %v1757_v6 = vld [vmem:[#allocation8 + $0xc8] ss:$12 sps:$4 sm:$0xff]  }
  0x84   :  { %945 = vmatprep.subr.bf16.mxu0 %v1725_v7  ;;  %986 = vmatprep.subr.bf16.mxu1 %v1728_v8  ;;  %v1758_v7 = vld [vmem:[#allocation8 + $0x248] ss:$12 sps:$4 sm:$0xff]  }
  0x85   :  { %v1759_v8 = vld [vmem:[#allocation8 + $0x8] ss:$12 sps:$4 sm:$0xff]  }
  0x87   :  { %946 = vmatpush2.bf16.msra.mxu0 %v1723_v9  ;;  %987 = vmatpush2.bf16.msra.mxu1 %v1726_v10  ;;  %v1760_v9 = vld [vmem:[#allocation8 + $0x188] ss:$12 sps:$4 sm:$0xff]   ;;  %v1761_v10 = vld [vmem:[#allocation10 + $0x78] sm:$0xff]  }
  0x88   :  { %1511 = vmatprep.subr.bf16.mxu0 %v1729_v11  ;;  %1533 = vmatprep.subr.bf16.mxu1 %v1730_v12  ;;  %v1762_v11 = vld [vmem:[#allocation10 + $0x38] sm:$0xff]   ;;  %v1763_v12 = vld [vmem:[#allocation10 + $0x70] sm:$0xff]  }
 0x10a   :  { %v202_v24 = vpop.f32.mrf.mxu0  ;;  %v243_v25 = vpop.f32.mrf.mxu1 }
 0x10b   :  { %v203_v26 = vadd.f32 %v202_v24, %v107_v20  ;;  %v244_v27 = vadd.f32 %v243_v25, %v115_v21  ;;  %v1767_v20 = vld [vmem:[#allocation10 + $0x60] sm:$0xff]   ;;  %v1771_v24 = vld [vmem:[#allocation10 + $0x50] sm:$0xff]  }
 0x10c   :  { %v204_v28 = vpop.f32.mrf.mxu0  ;;  %v245_v29 = vpop.f32.mrf.mxu1  ;;  %v1768_v21 = vld [vmem:[#allocation10 + $0x20] sm:$0xff]   ;;  %v1772_v25 = vld [vmem:[#allocation10 + $0x10] sm:$0xff]  }
 0x10d   :  { %v252_v30 = vmax.f32 %v244_v27, 0.0  ;;  %v205_v31 = vadd.f32 %v204_v28, %v111_v22  ;;  %v246_v32 = vadd.f32 %v245_v29, %v119_v23  ;;  %v250_v33 = vmax.f32 %v203_v26, 0.0  ;;  %v1769_v22 = vld [vmem:[#allocation10 + $0x58] sm:$0xff]   ;;  %v1773_v26 = vld [vmem:[#allocation10 + $0x48] sm:$0xff]   ;;  %v1775_v28 = vld [vmem:[#allocation10 + $0x40] sm:$0xff]  }
 0x10e   :  { %v206_v34 = vpop.f32.mrf.mxu0  ;;  %v247_v35 = vpop.f32.mrf.mxu1  ;;  %v1770_v23 = vld [vmem:[#allocation10 + $0x18] sm:$0xff]   ;;  %v1774_v27 = vld [vmem:[#allocation10 + $0x8] sm:$0xff]   ;;  %v1776_v29 = vld [vmem:[#allocation10] sm:$0xff]  }
 0x10f   :  { %v251_v36 = vmax.f32 %v205_v31, 0.0  ;;  %v253_v37 = vmax.f32 %v246_v32, 0.0  ;;  %v1995_v38 = vpack.c.bf16 %v252_v30, %v252_v30  ;;  %v1997_v45 = vpack.c.bf16 %v250_v33, %v250_v33  ;;  %v1777_v30 = vld [vmem:[#allocation10 + $0xb8] sm:$0xff]   ;;  %v1778_v32 = vld [vmem:[#allocation10 + $0xb0] sm:$0xff]   ;;  %v1779_v33 = vld [vmem:[#allocation10 + $0xa8] sm:$0xff]  }
 0x110   :  { %v207_v39 = vpop.f32.mrf.mxu0  ;;  %v248_v40 = vpop.f32.mrf.mxu1  ;;  %v1925_v31 = vmov 0.0   ;;  %v1780_v34 = vld [vmem:[#allocation10 + $0xa0] sm:$0xff]   ;;  %v1781_v35 = vld [vmem:[#allocation10 + $0x98] sm:$0xff]  }
 0x111   :  { %v255_v41 = vpack.c.bf16 %v251_v36, %v251_v36  ;;  %v257_v42 = vpack.c.bf16 %v253_v37, %v253_v37  ;;  %v1782_v36 = vld [vmem:[#allocation10 + $0x90] sm:$0xff]   ;;  %v1783_v37 = vld [vmem:[#allocation10 + $0x88] sm:$0xff]   ;;  %v386_v39 = vld [vmem:[%s2022_s4] sm:$0x7] }
 0x112   :  { %v391_v40 = vrot.slane %v386_v39, %v106_v15 }
 0x113   :  { %947 = vmatprep.mubr.bf16.mxu0 %v255_v41  ;;  %988 = vmatprep.mubr.bf16.mxu1 %v257_v42 }
 0x114   :  { %948 = vmatmul.mubr.bf16.vlgmr.msra.gmra.mxu0 %v1997_v45  ;;  %989 = vmatmul.mubr.bf16.vlgmr.msra.gmra.mxu1 %v1995_v38 }
 0x115   :  { %1512 = vmatpush3.bf16.msra.mxu0 %v1731_v43  ;;  %1534 = vmatpush3.bf16.msra.mxu1 %v1732_v44 }
 0x116   :  { %1029 = vmatprep.mubr.bf16.mxu0 %v255_v41  ;;  %1069 = vmatprep.mubr.bf16.mxu1 %v257_v42  ;;  %v395_v41 = vrot.slane %v386_v39, %v110_v18 }
 0x117   :  { %1513 = vmatprep.subr.bf16.mxu0 %v1733_v46  ;;  %1535 = vmatprep.subr.bf16.mxu1 %v1734_v47 }
 0x119   :  { %1514 = vmatpush3.bf16.msra.mxu0 %v1735_v48  ;;  %1536 = vmatpush3.bf16.msra.mxu1 %v1736_v49 }
 0x11a   :  { %1515 = vmatprep.subr.bf16.mxu0 %v1737_v50  ;;  %1537 = vmatprep.subr.bf16.mxu1 %v1738_v51 }
 0x11d   :  { %1516 = vmatpush3.bf16.msra.mxu0 %v1739_v52  ;;  %1538 = vmatpush3.bf16.msra.mxu1 %v1740_v53 }
 0x11e   :  { %1517 = vmatprep.subr.bf16.mxu0 %v1741_v54  ;;  %1539 = vmatprep.subr.bf16.mxu1 %v1742_v55 }
 0x121   :  { %1518 = vmatpush3.bf16.msra.mxu0 %v1743_v56  ;;  %1540 = vmatpush3.bf16.msra.mxu1 %v1744_v57 }
 0x122   :  { %1519 = vmatprep.subr.bf16.mxu0 %v1745_v58  ;;  %1541 = vmatprep.subr.bf16.mxu1 %v1746_v59  ;;  %v399_v58 = vrot.slane %v386_v39, %v114_v16 }
 0x125   :  { %1520 = vmatpush3.bf16.msra.mxu0 %v1747_v60  ;;  %1542 = vmatpush3.bf16.msra.mxu1 %v1748_v61 }
 0x126   :  { %1521 = vmatprep.subr.bf16.mxu0 %v1749_v62  ;;  %1543 = vmatprep.subr.bf16.mxu1 %v1750_v63 }
 0x129   :  { %1522 = vmatpush3.bf16.msra.mxu0 %v1751_v0  ;;  %1544 = vmatpush3.bf16.msra.mxu1 %v1752_v1 }
 0x12a   :  { %1523 = vmatprep.subr.bf16.mxu0 %v1753_v2  ;;  %1545 = vmatprep.subr.bf16.mxu1 %v1754_v3 }
 0x12d   :  { %1524 = vmatpush3.bf16.msra.mxu0 %v1755_v4  ;;  %1546 = vmatpush3.bf16.msra.mxu1 %v1756_v5 }
 0x12e   :  { %1525 = vmatprep.subr.bf16.mxu0 %v1757_v6  ;;  %1547 = vmatprep.subr.bf16.mxu1 %v1758_v7 }
 0x131   :  { %1526 = vmatpush3.bf16.msra.mxu0 %v1759_v8  ;;  %1548 = vmatpush3.bf16.msra.mxu1 %v1760_v9 }
 0x132   :  { %1555 = vmatprep.subr.bf16.mxu0 %v1761_v10  ;;  %1586 = vmatprep.subr.bf16.mxu1 %v1925_v31 }
 0x134   :  { %1030 = vmatmul.mubr.bf16.vlgmr.msra.gmra.mxu0 %v1997_v45  ;;  %1070 = vmatmul.mubr.bf16.vlgmr.msra.gmra.mxu1 %v1995_v38  ;;  %v1784_v38 = vld [vmem:[#allocation10 + $0x80] sm:$0xff]  }
 0x135   :  { %1556 = vmatpush3.bf16.msra.mxu0 %v1762_v11  ;;  %1587 = vmatpush3.bf16.msra.mxu1 %v1777_v30 }
 0x136   :  { %1557 = vmatprep.subr.bf16.mxu0 %v1763_v12  ;;  %1588 = vmatprep.subr.bf16.mxu1 %v1925_v31 }
 0x137   :  { %1602 = vmatprep.mubr.msk.bf16.mxu1 %vm1926_vm1, %v1925_v31 }
 0x139   :  { %1558 = vmatpush3.bf16.msra.mxu0 %v1764_v13  ;;  %1589 = vmatpush3.bf16.msra.mxu1 %v1778_v32 }
 0x13a   :  { %1559 = vmatprep.subr.bf16.mxu0 %v1765_v17  ;;  %1590 = vmatprep.subr.bf16.mxu1 %v1925_v31 }
 0x13d   :  { %1560 = vmatpush3.bf16.msra.mxu0 %v1766_v19  ;;  %1591 = vmatpush3.bf16.msra.mxu1 %v1779_v33 }
 0x13e   :  { %1561 = vmatprep.subr.bf16.mxu0 %v1767_v20  ;;  %1592 = vmatprep.subr.bf16.mxu1 %v1925_v31 }
 0x141   :  { %1562 = vmatpush3.bf16.msra.mxu0 %v1768_v21  ;;  %1593 = vmatpush3.bf16.msra.mxu1 %v1780_v34 }
 0x142   :  { %1563 = vmatprep.subr.bf16.mxu0 %v1769_v22  ;;  %1594 = vmatprep.subr.bf16.mxu1 %v1925_v31 }
 0x145   :  { %1564 = vmatpush3.bf16.msra.mxu0 %v1770_v23  ;;  %1595 = vmatpush3.bf16.msra.mxu1 %v1781_v35 }
 0x146   :  { %1565 = vmatprep.subr.bf16.mxu0 %v1771_v24  ;;  %1596 = vmatprep.subr.bf16.mxu1 %v1925_v31 }
 0x149   :  { %1566 = vmatpush3.bf16.msra.mxu0 %v1772_v25  ;;  %1597 = vmatpush3.bf16.msra.mxu1 %v1782_v36 }
 0x14a   :  { %1567 = vmatprep.subr.bf16.mxu0 %v1773_v26  ;;  %1598 = vmatprep.subr.bf16.mxu1 %v1925_v31 }
 0x14d   :  { %1568 = vmatpush3.bf16.msra.mxu0 %v1774_v27  ;;  %1599 = vmatpush3.bf16.msra.mxu1 %v1783_v37 }
 0x14e   :  { %1569 = vmatprep.subr.bf16.mxu0 %v1775_v28  ;;  %1600 = vmatprep.subr.bf16.mxu1 %v1925_v31 }
 0x151   :  { %1570 = vmatpush3.bf16.msra.mxu0 %v1776_v29  ;;  %1601 = vmatpush3.bf16.msra.mxu1 %v1784_v38 }
 0x1d4   :  { %v949_v42 = vpop.f32.mrf.mxu0  ;;  %v990_v43 = vpop.f32.mrf.mxu1 }
 0x1d5   :  { %v950_v44 = vadd.f32 %v949_v42, %v391_v40 }
 0x1d6   :  { %v951_v45 = vpop.f32.mrf.mxu0  ;;  %v992_v46 = vpop.f32.mrf.mxu1 }
 0x1d7   :  { %v991_v47 = vadd.f32 %v990_v43, %v950_v44  ;;  %v952_v48 = vadd.f32 %v951_v45, %v395_v41 }
 0x1d8   :  { %v953_v49 = vpop.f32.mrf.mxu0  ;;  %v994_v50 = vpop.f32.mrf.mxu1 }
 0x1d9   :  { %v993_v51 = vadd.f32 %v992_v46, %v952_v48  ;;  %v1077_v52 = vmax.f32 %v991_v47, 0.0 }
 0x1da   :  { %v954_v53 = vpop.f32.mrf.mxu0  ;;  %v995_v54 = vpop.f32.mrf.mxu1 }
 0x1db   :  { %v1078_v55 = vmax.f32 %v993_v51, 0.0  ;;  %v1080_v57 = vpack.c.bf16 %v1077_v52, %v1077_v52 }
 0x1dd   :  { %v1081_v56 = vpack.c.bf16 %v1078_v55, %v1078_v55 }
 0x1df   :  { %1314 = vmatprep.mubr.bf16.mxu0 %v1081_v56 }
 0x1e0   :  { %1315 = vmatmul.mubr.bf16.vlgmr.msra.gmra.mxu0 %v1080_v57 }
 0x1f4   :  { %v1527_v15 = vpop.f32.mrf.mxu0  ;;  %v1549_v18 = vpop.f32.mrf.mxu1 }
 0x1f6   :  { %v1528_v59 = vpop.f32.mrf.mxu0  ;;  %v1550_v60 = vpop.f32.mrf.mxu1 }
 0x1f7   :  { %v1529_v61 = vadd.f32 %v1528_v59, %v1527_v15  ;;  %v1551_v1 = vadd.f32 %v1550_v60, %v1549_v18 }
 0x1f8   :  { %v1530_v62 = vpop.f32.mrf.mxu0  ;;  %v1552_v63 = vpop.f32.mrf.mxu1 }
 0x1f9   :  { %v1032_v0 = vadd.f32 %v1529_v61, %v399_v58 }
 0x1fa   :  { %v1531_v2 = vpop.f32.mrf.mxu0  ;;  %v1553_v3 = vpop.f32.mrf.mxu1 }
 0x1fb   :  { %v1072_v4 = vadd.f32 %v1551_v1, %v1032_v0 }
 0x1fd   :  { %v1079_v5 = vmax.f32 %v1072_v4, 0.0 }
 0x1ff   :  { %v1082_v6 = vpack.c.bf16 %v1079_v5, %v1079_v5 }
 0x201   :  { %1603 = vmatmul.mubr.bf16.vlgmr.msra.gmra.mxu1 %v1082_v6 }
 0x2a0   :  { %v1571_v7 = vpop.f32.mrf.mxu0 }
 0x2a2   :  { %v1572_v8 = vpop.f32.mrf.mxu0 }
 0x2a3   :  { %v1573_v11 = vadd.f32 %v1572_v8, %v1571_v7 }
 0x2a4   :  { %v1574_v9 = vpop.f32.mrf.mxu0 }
 0x2a5   :  { %v1317_v16 = vadd.f32 %v1573_v11, %v1486_v14 }
 0x2a6   :  { %v1575_v10 = vpop.f32.mrf.mxu0 }
 0x2c1   :  { %v1356_v12 = vpop.f32.mrf.mxu1 }
 0x2c2   :  { %v1357_v13 = vadd.f32 %v1356_v12, %v1317_v16 }
 0x2c3   :  { %v1604_v17 = vpop.f32.mrf.mxu1 }
 0x2c4   :  { %1362 = vst [vmem:[#allocation11] sm:$0x3] %v1357_v13 }
 0x2c5   :  { %v1359_v19 = vpop.f32.mrf.mxu1 }
 0x2c6   :  { %1896 = shalt.err (!%p1893_p1)
}
 0x2c7   :  { %1372 = dma.vmem_to_hbm [thread:$0]  %s1370_s8, 32, %s2025_s7, [#allocation4]   ;;  %v1605_v20 = vpop.f32.mrf.mxu1 }
 0x2c8   :  { %1911 = dma.done.wait [#allocation4], 32  }
 0x2c9   :  { %1912 = vsyncadd [#allocation4], 4294967264 }
 0x2ca   :  { %1376 = vsyncpa [#allocation3], 1 }
 0x2cb   :  { %1377 = vsyncpa [#allocation6], 1 }
 0x2cc   :  { %1378 = vsyncpa [#allocation9], 1 }
 0x2cd   :  { %1379 = vsyncpa [#allocation4], 1 }

</bundles_post_ra>
